<compile_context>
chip_gen: v7x
topology: tpu7x:2x2x1
jax: 0.10.0
libtpu: 0.0.40
codegen_flags: <defaults>
</compile_context>

<pallas_src>
import jax
import jax.numpy as jnp
from jax.experimental import pallas as pl
from jax.experimental.pallas import tpu as pltpu


def _round_up(x: int, m: int) -> int:
    return ((x + m - 1) // m) * m


def _statistic_kernel(h_ref, w_ref, b_ref, out_ref):
    # h_ref:   [TB, N, H]    block of TB independent sets
    # w_ref:   [H, 2C]       linear weight (already transposed)
    # b_ref:   [1, 2C]       linear bias
    # out_ref: [TB, OUT_W]   lane-dense packed rows: [mean|logvar|a|zero-pad]
    h = h_ref[...]
    tb, n, hdim = h.shape
    two_c = w_ref.shape[-1]
    out_w = out_ref.shape[-1]

    # a = mean(h, dim=set) per set: sublane reduce over axis 1 + static scale.
    a = jnp.sum(h, axis=1) * (1.0 / n)                                    # [TB, H]

    # PostPool linear on the MXU with f32 accumulation.
    lin = jnp.dot(a, w_ref[...], preferred_element_type=jnp.float32)      # [TB, 2C]
    lin = lin + b_ref[...]

    # One lane-dense packed row per set, written with a single full-width store.
    pieces = [lin, a]
    pad = out_w - (two_c + hdim)
    if pad:
        pieces.append(jnp.zeros((tb, pad), jnp.float32))
    out_ref[...] = jnp.concatenate(pieces, axis=-1).astype(out_ref.dtype)


def statistic_forward_batched(h, w, b, *, tb=None):
    """B independent sets in one pallas_call.

    Args:
      h: [B, N, hid_dim] float32
      w: [hid_dim, 2*c_dim] float32 (transposed nn.Linear weight)
      b: [2*c_dim] float32
      tb: optional sets-per-grid-step override (rounded up to a multiple of 8).
    Returns:
      (mean [B, c_dim], logvar [B, c_dim], a [B, hid_dim])
    """
    batch, n, hid_dim = h.shape
    two_c = w.shape[1]
    c_dim = two_c // 2
    out_w = max(128, _round_up(two_c + hid_dim, 128))   # lane-dense packed width
    b2d = b.reshape(1, two_c).astype(jnp.float32)
    w = w.astype(jnp.float32)
    h = h.astype(jnp.float32)

    # Sets per grid step: take the whole batch when it is small, otherwise a
    # ~256-set block so each step carries real work (v7x TC sharding only then).
    if tb is None:
        tb = batch if batch <= 512 else 256
    tb = _round_up(max(1, min(tb, batch)), 8)
    padded_batch = _round_up(batch, tb)
    if padded_batch != batch:
        h = jnp.pad(h, ((0, padded_batch - batch), (0, 0), (0, 0)))
    num_blocks = padded_batch // tb

    cost = pl.CostEstimate(
        flops=int(batch * n * hid_dim + 2 * batch * hid_dim * two_c),
        transcendentals=0,
        bytes_accessed=int(h.size * h.dtype.itemsize
                           + w.size * w.dtype.itemsize
                           + two_c * 4
                           + padded_batch * out_w * 4),
    )

    packed = pl.pallas_call(
        _statistic_kernel,
        out_shape=jax.ShapeDtypeStruct((padded_batch, out_w), jnp.float32),
        grid=(num_blocks,),
        in_specs=[
            # TB sets per grid step.
            pl.BlockSpec((tb, n, hid_dim), lambda i: (i, 0, 0)),
            # Weight / bias: constant block index -> VMEM-resident across steps.
            pl.BlockSpec((hid_dim, two_c), lambda i: (0, 0)),
            pl.BlockSpec((1, two_c), lambda i: (0, 0)),
        ],
        out_specs=pl.BlockSpec((tb, out_w), lambda i: (i, 0)),
        compiler_params=pltpu.CompilerParams(
            # Shard the batch across TCs only when there are multiple steps.
            dimension_semantics=("parallel",) if num_blocks > 1 else ("arbitrary",)),
        cost_estimate=cost,
    )(h, w, b2d)

    packed = packed[:batch]
    mean = packed[:, :c_dim]
    logvar = packed[:, c_dim:two_c]
    a = packed[:, two_c:two_c + hid_dim]
    return mean, logvar, a


def statistic_forward(h, w, b):
    """Pallas implementation of StatistiC.forward (single set, module semantics).

    Args:
      h: [N, hid_dim] float32
      w: [hid_dim, 2*c_dim] float32 (transposed nn.Linear weight)
      b: [2*c_dim] float32
    Returns:
      (mean [1, c_dim], logvar [1, c_dim], a [1, hid_dim], None)
    """
    mean, logvar, a = statistic_forward_batched(h[None], w, b)
    return mean, logvar, a, None


if __name__ == "__main__":
    # Small shapes consistent with the module: set size N=8, hid_dim=32, c_dim=16.
    N, HID_DIM, C_DIM, BATCH = 8, 32, 16, 4

    key = jax.random.PRNGKey(0)
    k_h, k_w, k_b = jax.random.split(key, 3)

    hb = jax.random.normal(k_h, (BATCH, N, HID_DIM), dtype=jnp.float32)
    # nn.Linear(hid_dim, 2*c_dim): PyTorch weight is [2*c_dim, hid_dim]; we store
    # its transpose.
    bound = 1.0 / jnp.sqrt(HID_DIM)
    w = jax.random.uniform(k_w, (HID_DIM, 2 * C_DIM), jnp.float32, -bound, bound)
    b = jax.random.uniform(k_b, (2 * C_DIM,), jnp.float32, -bound, bound)

    # --- single-set path (matches StatistiC.forward exactly) ---
    h0 = hb[0]
    mean, logvar, a, none_out = statistic_forward(h0, w, b)
    jax.block_until_ready((mean, logvar, a))

    a_ref = jnp.mean(h0, axis=0, keepdims=True)
    out_ref = a_ref @ w + b
    mean_ref, logvar_ref = out_ref[:, :C_DIM], out_ref[:, C_DIM:]
    assert mean.shape == (1, C_DIM) and logvar.shape == (1, C_DIM)
    assert a.shape == (1, HID_DIM) and none_out is None
    assert jnp.allclose(a, a_ref, atol=1e-5, rtol=1e-5)
    assert jnp.allclose(mean, mean_ref, atol=1e-5, rtol=1e-5)
    assert jnp.allclose(logvar, logvar_ref, atol=1e-5, rtol=1e-5)

    # --- batched path: whole batch in one grid step ---
    mean_b, logvar_b, a_b = statistic_forward_batched(hb, w, b)
    jax.block_until_ready((mean_b, logvar_b, a_b))

    a_bref = jnp.mean(hb, axis=1)
    out_bref = a_bref @ w + b
    assert mean_b.shape == (BATCH, C_DIM) and logvar_b.shape == (BATCH, C_DIM)
    assert a_b.shape == (BATCH, HID_DIM)
    assert jnp.allclose(a_b, a_bref, atol=1e-5, rtol=1e-5)
    assert jnp.allclose(mean_b, out_bref[:, :C_DIM], atol=1e-5, rtol=1e-5)
    assert jnp.allclose(logvar_b, out_bref[:, C_DIM:], atol=1e-5, rtol=1e-5)

    # --- multi-step grid path (ragged batch, forced small TB, parallel grid) ---
    BATCH2 = 20
    hb2 = jax.random.normal(jax.random.PRNGKey(1), (BATCH2, N, HID_DIM),
                            dtype=jnp.float32)
    mean2, logvar2, a2 = statistic_forward_batched(hb2, w, b, tb=8)
    jax.block_until_ready((mean2, logvar2, a2))

    a2_ref = jnp.mean(hb2, axis=1)
    out2_ref = a2_ref @ w + b
    assert mean2.shape == (BATCH2, C_DIM) and a2.shape == (BATCH2, HID_DIM)
    assert jnp.allclose(a2, a2_ref, atol=1e-5, rtol=1e-5)
    assert jnp.allclose(mean2, out2_ref[:, :C_DIM], atol=1e-5, rtol=1e-5)
    assert jnp.allclose(logvar2, out2_ref[:, C_DIM:], atol=1e-5, rtol=1e-5)

    print("KERNEL_OK")
</pallas_src>

<mosaic_0001>
module attributes {stable_mosaic.version = 11 : i64} {
  func.func @_statistic_kernel(%arg0: i32, %arg1: memref<8x8x32xf32, #tpu.memory_space<vmem>>, %arg2: memref<32x32xf32, #tpu.memory_space<vmem>>, %arg3: memref<1x32xf32, #tpu.memory_space<vmem>>, %arg4: memref<8x128xf32, #tpu.memory_space<vmem>>) attributes {dimension_semantics = [#tpu.dimension_semantics<arbitrary>], iteration_bounds = array<i64: 1>, scalar_prefetch = 0 : i64, scratch_operands = 0 : i64, tpu.core_type = #tpu.core_type<tc>, window_params = [{transform_indices = @transform_0, window_bounds = array<i64: 8, 8, 32>}, {pipeline_mode = #tpu.pipeline_mode<synchronous>, transform_indices = @transform_1, window_bounds = array<i64: 32, 32>}, {pipeline_mode = #tpu.pipeline_mode<synchronous>, transform_indices = @transform_2, window_bounds = array<i64: 1, 32>}, {transform_indices = @transform_3, window_bounds = array<i64: 8, 128>}]} {
    %c0 = arith.constant 0 : index
    %c0_0 = arith.constant 0 : index
    %c0_1 = arith.constant 0 : index
    %0 = vector.load %arg1[%c0, %c0_0, %c0_1] : memref<8x8x32xf32, #tpu.memory_space<vmem>>, vector<8x8x32xf32>
    %cst = arith.constant dense<0.000000e+00> : vector<8x32xf32>
    %1 = vector.multi_reduction <add>, %0, %cst [1] : vector<8x8x32xf32> to vector<8x32xf32>
    %cst_2 = arith.constant 1.250000e-01 : f32
    %2 = vector.broadcast %cst_2 : f32 to vector<8x32xf32>
    %3 = arith.mulf %1, %2 : vector<8x32xf32>
    %c0_3 = arith.constant 0 : index
    %c0_4 = arith.constant 0 : index
    %4 = vector.load %arg2[%c0_3, %c0_4] : memref<32x32xf32, #tpu.memory_space<vmem>>, vector<32x32xf32>
    %cst_5 = arith.constant dense<0.000000e+00> : vector<8x32xf32>
    %5 = tpu.matmul %3, %4, %cst_5 {dimension_numbers = #tpu.dot_dimension_numbers<[1], [0], [0], [1], [0, 0, 1, 1], [], []>} : vector<8x32xf32>, vector<32x32xf32>, vector<8x32xf32> -> vector<8x32xf32>
    %c0_6 = arith.constant 0 : index
    %c0_7 = arith.constant 0 : index
    %6 = vector.load %arg3[%c0_6, %c0_7] : memref<1x32xf32, #tpu.memory_space<vmem>>, vector<1x32xf32>
    %7 = vector.broadcast %6 : vector<1x32xf32> to vector<8x32xf32>
    %8 = arith.addf %5, %7 : vector<8x32xf32>
    %cst_8 = arith.constant 0.000000e+00 : f32
    %9 = vector.broadcast %cst_8 : f32 to vector<8x64xf32>
    %10 = tpu.concatenate %8, %3, %9 in 1 : vector<8x32xf32>, vector<8x32xf32>, vector<8x64xf32> -> vector<8x128xf32>
    %c0_9 = arith.constant 0 : index
    %c0_10 = arith.constant 0 : index
    %11 = vector.load %arg4[%c0_9, %c0_10] : memref<8x128xf32, #tpu.memory_space<vmem>>, vector<8x128xf32>
    tpu.vector_store %arg4[%c0_9, %c0_10], %10 {strides = array<i32>} : memref<8x128xf32, #tpu.memory_space<vmem>>, vector<8x128xf32>,
    return
  }
  func.func @transform_0(%arg0: i32) -> (i32, i32, i32) {
    %c0_i32 = arith.constant 0 : i32
    %c0_i32_0 = arith.constant 0 : i32
    %c0_i32_1 = arith.constant 0 : i32
    return %arg0, %c0_i32, %c0_i32_0 : i32, i32, i32
  }
  func.func @transform_1(%arg0: i32) -> (i32, i32) {
    %c0_i32 = arith.constant 0 : i32
    %c0_i32_0 = arith.constant 0 : i32
    %c0_i32_1 = arith.constant 0 : i32
    return %c0_i32, %c0_i32_0 : i32, i32
  }
  func.func @transform_2(%arg0: i32) -> (i32, i32) {
    %c0_i32 = arith.constant 0 : i32
    %c0_i32_0 = arith.constant 0 : i32
    %c0_i32_1 = arith.constant 0 : i32
    return %c0_i32, %c0_i32_0 : i32, i32
  }
  func.func @transform_3(%arg0: i32) -> (i32, i32) {
    %c0_i32 = arith.constant 0 : i32
    %c0_i32_0 = arith.constant 0 : i32
    return %arg0, %c0_i32 : i32, i32
  }
}

</mosaic_0001>

<bundles_post_ra>
// kernel: tpu_custom_call.1
= control target key start
LH: loop header
LB: loop body
LE: loop exit
PB: predicated region body
PF: predicated region fallthrough
CT: control target
= control target key end

     0   :  { %8 = vsyncpa [#allocation3], 0  ;;  %s431_s0 = inlined_call_operand.hbm [shape: f32[8,8,32], index: 0, kind: input, shape index: {}]   ;;  %s432_s1 = inlined_call_operand.hbm [shape: f32[32,32], index: 1, kind: input, shape index: {}]   ;;  %s433_s2 = inlined_call_operand.vmem [shape: f32[1,32], index: 2, kind: input, shape index: {}]   ;;  %s434_s3 = inlined_call_operand.hbm [shape: f32[8,128], index: 3, kind: output, shape index: {}]  }
   0x1   :  { %9 = vsyncpa [#allocation6], 0 }
   0x2   :  { %10 = vsyncpa [#allocation4], 0  ;;  %s349_s12 = smov [#allocation2]   ;;  %s277_s16 = scalar_lea.hbm %s431_s0, 1024 }
   0x3   :  { %s16_s13 = sshll.u32 %s349_s12, 4  ;;  %p278_p0 = scmp.ne.s32.totalorder %s431_s0, %s277_s16  ;;  %s17_s13 = int_to_ptr.vmem [resolvable:$true] %s16_s13 }
   0x4   :  { %p281_p1 = scmp.lt.u32.totalorder %s277_s16, %s431_s0 }
   0x6   :  { %p283_p2 = pnand %p281_p1, %p278_p0 }
   0x8   :  { %286 = shalt.err (!%p283_p2)
}
   0x9   :  { %s287_s21 = scalar_lea.vmem %s17_s13, 1024  ;;  %p292_p4 = scmp.lt.s32.totalorder %s17_s13, %s17_s13 }
   0xa   :  { %p288_p3 = scmp.ne.s32.totalorder %s17_s13, %s287_s21  ;;  %p293_p5 = scmp.lt.s32.totalorder %s287_s21, %s287_s21 }
   0xc   :  { %p294_p6 = por %p293_p5, %p292_p4 }
   0xe   :  { %p295_p7 = pnand %p294_p6, %p288_p3 }
  0x10   :  { %298 = shalt.err (!%p295_p7)
}
  0x11   :  { %s350_s22 = smov 128   ;;  %s351_s23 = smov 8  }
  0x12   :  { %22 = dma.hbm_to_vmem [thread:$0]  %s431_s0, 1024, %s17_s13, [#allocation3], %s350_s22, %s350_s22, %s351_s23  }
  0x13   :  { %s352_s26 = smov [#allocation5]   ;;  %s299_s30 = scalar_lea.hbm %s432_s1, 512 }
  0x14   :  { %s28_s27 = sshll.u32 %s352_s26, 4  ;;  %p300_p8 = scmp.ne.s32.totalorder %s432_s1, %s299_s30  ;;  %s29_s27 = int_to_ptr.vmem [resolvable:$true] %s28_s27 }
  0x15   :  { %p303_p9 = scmp.lt.u32.totalorder %s299_s30, %s432_s1 }
  0x17   :  { %p305_p10 = pnand %p303_p9, %p300_p8 }
  0x19   :  { %308 = shalt.err (!%p305_p10)
}
  0x1a   :  { %s309_s8 = scalar_lea.vmem %s29_s27, 512  ;;  %p314_p12 = scmp.lt.s32.totalorder %s29_s27, %s29_s27 }
  0x1b   :  { %p310_p11 = scmp.ne.s32.totalorder %s29_s27, %s309_s8  ;;  %p315_p13 = scmp.lt.s32.totalorder %s309_s8, %s309_s8 }
  0x1d   :  { %p316_p0 = por %p315_p13, %p314_p12 }
  0x1f   :  { %p317_p1 = pnand %p316_p0, %p310_p11 }
  0x21   :  { %320 = shalt.err (!%p317_p1)
}
  0x22   :  { %34 = dma.hbm_to_vmem [thread:$0]  %s432_s1, 512, %s29_s27, [#allocation6], %s350_s22, %s350_s22, %s351_s23  }
  0x23   :  { %343 = dma.done.wait [#allocation3], 1024  }
  0x24   :  { %344 = vsyncadd [#allocation3], 4294966272 }
  0x25   :  { %345 = dma.done.wait [#allocation6], 512  }
  0x26   :  { %346 = vsyncadd [#allocation6], 4294966784  ;;  %v353_v0 = vmov 0.0|0.0   ;;  %vm354_vm0 = vmmov 0   ;;  %v355_v1 = vmov 0.0   ;;  %vm51_vm1 = vcmask 261120  }
  0x27   :  { %262 = vmatprep.subr.bf16.mxu0 %v353_v0  ;;  %259 = vmatprep.mubr.msk.f32.mxu0 %vm354_vm0, %v355_v1  ;;  %v116_v2 = vld [vmem:[#allocation5] sm:$0xff]  ;;  %v117_v3 = vld [vmem:[#allocation5 + $0x8] sm:$0xff]  ;;  %v118_v4 = vld [vmem:[#allocation5 + $0x10] sm:$0xff]  ;;  %vm135_vm2 = vcmask 1041409   ;;  %vm137_vm3 = vcmask 1042434   ;;  %vm139_vm4 = vcmask 1043459  }
  0x28   :  { %v263_v5 = vpack.c.bf16 %v117_v3, %v116_v2  ;;  %v119_v6 = vld [vmem:[#allocation5 + $0x18] sm:$0xff]  ;;  %v43_v7 = vld [vmem:[#allocation2] sm:$0xff]  ;;  %v44_v8 = vld [vmem:[#allocation2 + $0x8] sm:$0xff]  ;;  %vm141_vm5 = vcmask 1044484   ;;  %vm143_vm6 = vcmask 1045509   ;;  %vm145_vm7 = vcmask 1046534  }
  0x29   :  { %v45_v9 = vld [vmem:[#allocation2 + $0x10] sm:$0xff]  ;;  %v46_v10 = vld [vmem:[#allocation2 + $0x18] sm:$0xff]  ;;  %v47_v11 = vld [vmem:[#allocation2 + $0x20] sm:$0xff]  ;;  %v52_v12 = vsel %vm51_vm1, %v43_v7, 0.0  ;;  %v59_v13 = vsel %vm51_vm1, %v44_v8, 0.0  ;;  %v266_v14 = vpack.c.bf16 %v119_v6, %v118_v4  ;;  %vm147_vm8 = vcmask 1047559  }
  0x2a   :  { %264 = vmatpush3.bf16.msra.mxu0 %v263_v5  ;;  %v48_v15 = vld [vmem:[#allocation2 + $0x28] sm:$0xff]  ;;  %v49_v16 = vld [vmem:[#allocation2 + $0x30] sm:$0xff]  ;;  %v50_v17 = vld [vmem:[#allocation2 + $0x38] sm:$0xff]  ;;  %v53_v18 = vrot.slane %v52_v12, 4  ;;  %v60_v19 = vrot.slane %v59_v13, 4  ;;  %v66_v20 = vsel %vm51_vm1, %v45_v9, 0.0 }
  0x2b   :  { %265 = vmatprep.subr.bf16.mxu0 %v353_v0  ;;  %v67_v21 = vrot.slane %v66_v20, 4  ;;  %v73_v22 = vsel %vm51_vm1, %v46_v10, 0.0  ;;  %v80_v23 = vsel %vm51_vm1, %v47_v11, 0.0  ;;  %v87_v24 = vsel %vm51_vm1, %v48_v15, 0.0  ;;  %s356_s1 = smov 32   ;;  %s357_s12 = smov [#allocation7]  }
  0x2c   :  { %v54_v25 = vadd.f32 %v53_v18, %v52_v12  ;;  %v61_v26 = vadd.f32 %v60_v19, %v59_v13  ;;  %v74_v27 = vrot.slane %v73_v22, 4  ;;  %v81_v28 = vrot.slane %v80_v23, 4  ;;  %s234_s13 = sshll.u32 %s357_s12, 4  ;;  %s235_s13 = int_to_ptr.vmem [resolvable:$true] %s234_s13 }
  0x2d   :  { %v68_v29 = vadd.f32 %v67_v21, %v66_v20  ;;  %v88_v30 = vrot.slane %v87_v24, 4  ;;  %v94_v31 = vsel %vm51_vm1, %v49_v16, 0.0  ;;  %v101_v32 = vsel %vm51_vm1, %v50_v17, 0.0  ;;  %s321_s14 = scalar_lea.vmem %s235_s13, 128  ;;  %p326_p3 = scmp.lt.s32.totalorder %s235_s13, %s235_s13 }
  0x2e   :  { %267 = vmatpush3.bf16.msra.mxu0 %v266_v14  ;;  %v55_v33 = vrot.slane %v54_v25, 2  ;;  %v62_v34 = vrot.slane %v61_v26, 2  ;;  %v75_v35 = vadd.f32 %v74_v27, %v73_v22  ;;  %v82_v36 = vadd.f32 %v81_v28, %v80_v23  ;;  %v244_v23 = vld [vmem:[%s433_s2] ss:$0 sm:$0xff]  ;;  %p322_p2 = scmp.ne.s32.totalorder %s235_s13, %s321_s14  ;;  %p327_p4 = scmp.lt.s32.totalorder %s321_s14, %s321_s14 }
  0x2f   :  { %v69_v37 = vrot.slane %v68_v29, 2  ;;  %v89_v38 = vadd.f32 %v88_v30, %v87_v24  ;;  %v95_v39 = vrot.slane %v94_v31, 4  ;;  %v102_v40 = vrot.slane %v101_v32, 4 }
  0x30   :  { %v56_v41 = vadd.f32 %v55_v33, %v54_v25  ;;  %v63_v42 = vadd.f32 %v62_v34, %v61_v26  ;;  %v76_v43 = vrot.slane %v75_v35, 2  ;;  %v83_v44 = vrot.slane %v82_v36, 2  ;;  %p328_p5 = por %p327_p4, %p326_p3 }
  0x31   :  { %v70_v45 = vadd.f32 %v69_v37, %v68_v29  ;;  %v90_v46 = vrot.slane %v89_v38, 2  ;;  %v96_v47 = vadd.f32 %v95_v39, %v94_v31  ;;  %v103_v48 = vadd.f32 %v102_v40, %v101_v32 }
  0x32   :  { %v57_v49 = vrot.slane %v56_v41, 1  ;;  %v64_v50 = vrot.slane %v63_v42, 1  ;;  %v77_v51 = vadd.f32 %v76_v43, %v75_v35  ;;  %v84_v52 = vadd.f32 %v83_v44, %v82_v36  ;;  %p329_p6 = pnand %p328_p5, %p322_p2 }
  0x33   :  { %v71_v53 = vrot.slane %v70_v45, 1  ;;  %v91_v54 = vadd.f32 %v90_v46, %v89_v38  ;;  %v97_v55 = vrot.slane %v96_v47, 2  ;;  %v104_v56 = vrot.slane %v103_v48, 2 }
  0x34   :  { %v58_v57 = vadd.f32 %v57_v49, %v56_v41  ;;  %v65_v58 = vadd.f32 %v64_v50, %v63_v42  ;;  %v78_v59 = vrot.slane %v77_v51, 1  ;;  %v85_v60 = vrot.slane %v84_v52, 1 }
  0x35   :  { %v72_v61 = vadd.f32 %v71_v53, %v70_v45  ;;  %v92_v62 = vrot.slane %v91_v54, 1  ;;  %v98_v63 = vadd.f32 %v97_v55, %v96_v47  ;;  %v105_v0 = vadd.f32 %v104_v56, %v103_v48 }
  0x36   :  { %v79_v1 = vadd.f32 %v78_v59, %v77_v51  ;;  %v86_v2 = vadd.f32 %v85_v60, %v84_v52  ;;  %v108_v3 = vmul.f32 0.125, %v58_v57  ;;  %v109_v4 = vmul.f32 0.125, %v65_v58 }
  0x37   :  { %v93_v5 = vadd.f32 %v92_v62, %v91_v54  ;;  %v99_v6 = vrot.slane %v98_v63, 1  ;;  %v106_v7 = vrot.slane %v105_v0, 1  ;;  %v110_v8 = vmul.f32 0.125, %v72_v61 }
  0x38   :  { %v111_v9 = vmul.f32 0.125, %v79_v1  ;;  %v112_v10 = vmul.f32 0.125, %v86_v2  ;;  %v136_v11 = vsel %vm135_vm2, %v109_v4, %v108_v3  ;;  %vm225_vm9 = vcmask 523264  }
  0x39   :  { %v100_v12 = vadd.f32 %v99_v6, %v98_v63  ;;  %v107_v13 = vadd.f32 %v106_v7, %v105_v0  ;;  %v113_v14 = vmul.f32 0.125, %v93_v5  ;;  %v138_v15 = vsel %vm137_vm3, %v110_v8, %v136_v11 }
  0x3a   :  { %v140_v16 = vsel %vm139_vm4, %v111_v9, %v138_v15 }
  0x3b   :  { %v114_v17 = vmul.f32 0.125, %v100_v12  ;;  %v115_v18 = vmul.f32 0.125, %v107_v13  ;;  %v142_v19 = vsel %vm141_vm5, %v112_v10, %v140_v16 }
  0x3c   :  { %v144_v20 = vsel %vm143_vm6, %v113_v14, %v142_v19 }
  0x3d   :  { %v146_v21 = vsel %vm145_vm7, %v114_v17, %v144_v20 }
  0x3e   :  { %v148_v22 = vsel %vm147_vm8, %v115_v18, %v146_v21 }
  0x3f   :  { %260 = vmatmul.mubr.msk.f32.vlgmr.msra.gmra.mrb[0].mxu0 %vm51_vm1, %v148_v22  ;;  %221 = vrot.lane.b32.xlu0 %v148_v22, %s356_s1 }
  0xb1   :  { %v222_v25 = vpop.permute.xlu0 %221 }
 0x112   :  { %v217_v24 = vpop.f32.mrb[0].mxu0 }
 0x113   :  { %v218_v26 = vadd.f32 %v244_v23, %v217_v24  ;;  %v261_v27 = vpop.f32.mrb[1].mxu0 }
 0x115   :  { %v224_v28 = vsel %vm51_vm1, %v218_v26, %v222_v25 }
 0x116   :  { %v226_v29 = vsel %vm225_vm9, %v224_v28, 0.0 }
 0x117   :  { %227 = vst [vmem:[#allocation7] sm:$0xff] %v226_v29 }
 0x118   :  { %332 = shalt.err (!%p329_p6)
}
 0x119   :  { %s333_s16 = scalar_lea.hbm %s434_s3, 128 }
 0x11a   :  { %p334_p7 = scmp.ne.s32.totalorder %s434_s3, %s333_s16  ;;  %p337_p8 = scmp.lt.u32.totalorder %s333_s16, %s434_s3 }
 0x11c   :  { %p339_p9 = pnand %p337_p8, %p334_p7 }
 0x11e   :  { %342 = shalt.err (!%p339_p9)
}
 0x11f   :  { %237 = dma.vmem_to_hbm [thread:$0]  %s235_s13, 128, %s434_s3, [#allocation4]  }
 0x120   :  { %347 = dma.done.wait [#allocation4], 128  }
 0x121   :  { %348 = vsyncadd [#allocation4], 4294967168 }
 0x122   :  { %241 = vsyncpa [#allocation3], 1 }
 0x123   :  { %242 = vsyncpa [#allocation6], 1 }
 0x124   :  { %243 = vsyncpa [#allocation4], 1 }

</bundles_post_ra>
